<compile_context>
chip_gen: v5e
topology: v5e:2x2
jax: 0.10.0
libtpu: 0.0.40
codegen_flags: <defaults>
</compile_context>

<pallas_src>
import functools

import jax
import jax.numpy as jnp
from jax import lax
from jax.experimental import pallas as pl
from jax.experimental.pallas import tpu as pltpu


# ----------------------------------------------------------------------------
# Kernel
# ----------------------------------------------------------------------------
def _pinn_mlp_kernel(num_layers, lane_chunk, use_bf16,
                     x_ref, y_ref, w0x_ref, w0y_ref, b0_ref, *refs):
    """Feature-major MLP forward on one batch tile.

    x_ref, y_ref : (1, tile_n)        -- batch points on the lane axis.
    w0x_ref/w0y_ref : (h1, 1)         -- first-layer weight columns (split in wrapper).
    b0_ref : (h1, 1)
    refs = (w1, b1, ..., w_{L-1}, b_{L-1}, out_ref)
      w_i : (out_i, in_i) (torch Linear order), b_i : (out_i, 1)
    Hidden layers: tanh(W @ a + b); final layer: W @ a + b (no activation).
    """
    out_ref = refs[-1]
    tile_n = x_ref.shape[-1]
    n_chunks = tile_n // lane_chunk
    act_dtype = jnp.bfloat16 if use_bf16 else jnp.float32
    h1 = w0x_ref.shape[0]

    # --- Load tiny params once per tile; hoist every broadcast / cast out of
    # --- the chunk loop (JAX does not CSE broadcast_in_dim).
    w0x = jnp.broadcast_to(w0x_ref[...].astype(jnp.float32), (h1, lane_chunk))
    w0y = jnp.broadcast_to(w0y_ref[...].astype(jnp.float32), (h1, lane_chunk))
    b0 = jnp.broadcast_to(b0_ref[...].astype(jnp.float32), (h1, lane_chunk))

    n_rest = num_layers - 1
    ws = [refs[2 * i][...].astype(act_dtype) for i in range(n_rest)]
    bs = [
        jnp.broadcast_to(refs[2 * i + 1][...].astype(jnp.float32),
                         (refs[2 * i].shape[0], lane_chunk))
        for i in range(n_rest)
    ]

    def mlp(xc, yc):
        # Layer 0 (K = 2): scalar-broadcast FMAs on the VPU. xc/yc are (1, L)
        # and broadcast along the sublane axis.
        z = w0x * xc + w0y * yc + b0
        if num_layers == 1:
            return z
        a = jnp.tanh(z.astype(act_dtype))
        for li in range(n_rest):
            z = jnp.dot(ws[li], a, preferred_element_type=jnp.float32) + bs[li]
            # bf16 tanh (~2x EUP throughput on v6e/v7x) when use_bf16; the
            # final layer keeps its f32 result with no activation.
            a = jnp.tanh(z.astype(act_dtype)) if li < n_rest - 1 else z
        return a

    if n_chunks == 1:
        out_ref[...] = mlp(
            x_ref[...].astype(jnp.float32),
            y_ref[...].astype(jnp.float32),
        ).astype(out_ref.dtype)
    else:
        def body(c, carry):
            start = pl.multiple_of(c * lane_chunk, 128)
            sl = pl.ds(start, lane_chunk)
            out_ref[:, sl] = mlp(
                x_ref[:, sl].astype(jnp.float32),
                y_ref[:, sl].astype(jnp.float32),
            ).astype(out_ref.dtype)
            return carry

        # fori_loop keeps LLO scheduler visibility with bounded vreg pressure
        # (a static Python for would keep all chunk activations live).
        lax.fori_loop(0, n_chunks, body, 0, unroll=min(n_chunks, 8))


# ----------------------------------------------------------------------------
# Wrapper
# ----------------------------------------------------------------------------
def _round_up(v, m):
    return ((v + m - 1) // m) * m


_SINGLE_TILE_MAX = 32768   # below this, one grid step (per-step overhead dominates)
_LARGE_TILE = 16384        # per-step lane count for large collocation batches


def _choose_tiling(n, force_tile_n=None):
    """Returns (n_pad, tile_n). Grid = n_pad // tile_n."""
    if force_tile_n is not None:
        assert force_tile_n % 128 == 0, "tile_n must be a multiple of 128"
        return _round_up(n, force_tile_n), force_tile_n
    if n <= _SINGLE_TILE_MAX:
        # Small N: collapse to one grid step; splitting is pure 0.35us/step
        # overhead on any generation.
        n_pad = _round_up(n, 128)
        return n_pad, n_pad
    # Large N: big tiles to amortize step overhead; even tile count so v7x's
    # two TensorCores get balanced work under "parallel" semantics.
    tile_n = _LARGE_TILE
    n_tiles = pl.cdiv(n, tile_n)
    if n_tiles % 2 == 1:
        n_tiles += 1
    return n_tiles * tile_n, tile_n


def pinn_poisson_2d_forward(x, y, weights, biases, *, use_bf16=False,
                            force_tile_n=None):
    """Pallas equivalent of PINN_Poisson_2d.forward(x, y).

    x, y       : (N, 1) float32 arrays.
    weights[i] : (layers[i+1], layers[i])  (torch Linear (out, in) order)
    biases[i]  : (layers[i+1], 1)
    use_bf16   : bf16 MXU inputs + bf16 tanh (f32 accumulation). Leave False
                 on v5e or when PINN-derivative accuracy matters.
    Returns (N, layers[-1]) float32.
    """
    n = x.shape[0]
    num_layers = len(weights)
    assert weights[0].shape[1] == 2, "forward(x, y) implies in_dim == 2"
    out_dim = weights[-1].shape[0]

    # Feature-major rows: (N, 1) -> (1, N); no stacked copy of the input.
    x_row = x.reshape(1, n).astype(jnp.float32)
    y_row = y.reshape(1, n).astype(jnp.float32)

    n_pad, tile_n = _choose_tiling(n, force_tile_n)
    if n_pad != n:
        pad = ((0, 0), (0, n_pad - n))
        x_row = jnp.pad(x_row, pad)
        y_row = jnp.pad(y_row, pad)

    grid = (n_pad // tile_n,)
    lane_chunk = 512 if tile_n % 512 == 0 else tile_n

    row_spec = pl.BlockSpec((1, tile_n), lambda i: (0, i))
    in_specs = [row_spec, row_spec]

    # First-layer weight split into its two columns in the wrapper (tiny XLA
    # slice) so the kernel only ever lane-broadcasts (h1, 1) columns.
    h1 = weights[0].shape[0]
    w0x = weights[0][:, 0:1]
    w0y = weights[0][:, 1:2]
    flat_params = [w0x, w0y, biases[0]]
    in_specs += [
        pl.BlockSpec(w0x.shape, lambda i: (0, 0)),
        pl.BlockSpec(w0y.shape, lambda i: (0, 0)),
        pl.BlockSpec(biases[0].shape, lambda i: (0, 0)),
    ]
    for w, b in zip(weights[1:], biases[1:]):
        # Tiny params: full-extent blocks, resident in VMEM.
        in_specs.append(pl.BlockSpec(w.shape, lambda i: (0, 0)))
        in_specs.append(pl.BlockSpec(b.shape, lambda i: (0, 0)))
        flat_params.extend([w, b])

    out_spec = pl.BlockSpec((out_dim, tile_n), lambda i: (0, i))

    # "parallel" only buys anything with >= 2 tiles (v7x megacore); for the
    # single-step small-N case it is irrelevant.
    semantics = ("parallel",) if grid[0] > 1 else ("arbitrary",)

    out = pl.pallas_call(
        functools.partial(_pinn_mlp_kernel, num_layers, lane_chunk, use_bf16),
        out_shape=jax.ShapeDtypeStruct((out_dim, n_pad), jnp.float32),
        grid_spec=pltpu.PrefetchScalarGridSpec(
            num_scalar_prefetch=0,
            grid=grid,
            in_specs=in_specs,
            out_specs=out_spec,
        ),
        compiler_params=pltpu.CompilerParams(dimension_semantics=semantics),
    )(x_row, y_row, *flat_params)

    # Padded lanes hold tanh(bias)-propagated garbage; slice before any
    # downstream reduction. Return in the module's (N, out_dim) orientation.
    return out[:, :n].T


# ----------------------------------------------------------------------------
# Parameter init (matches the module's init semantics) and pure-JAX reference
# ----------------------------------------------------------------------------
def init_params(layers, key):
    """Xavier-normal weights (gain=1.0), zero biases. Weights in torch
    (out, in) order; biases as (out, 1) columns."""
    weights, biases = [], []
    for i in range(len(layers) - 1):
        key, sub = jax.random.split(key)
        fan_in, fan_out = layers[i], layers[i + 1]
        std = (2.0 / (fan_in + fan_out)) ** 0.5
        w = std * jax.random.normal(sub, (fan_out, fan_in), dtype=jnp.float32)
        b = jnp.zeros((fan_out, 1), dtype=jnp.float32)
        weights.append(w)
        biases.append(b)
    return weights, biases


def _reference_forward(x, y, weights, biases):
    a = jnp.concatenate([x, y], axis=1)  # (N, 2), row-major like the torch code
    for i, (w, b) in enumerate(zip(weights, biases)):
        z = a @ w.T + b.T
        a = jnp.tanh(z) if i < len(weights) - 1 else z
    return a


if __name__ == "__main__":
    layers = [2, 32, 32, 1]          # (x, y) -> 32 -> 32 -> u
    n_points = 1000                  # pads to 1024 lanes

    key = jax.random.PRNGKey(0)
    key, kx, ky = jax.random.split(key, 3)
    x = jax.random.uniform(kx, (n_points, 1), dtype=jnp.float32)
    y = jax.random.uniform(ky, (n_points, 1), dtype=jnp.float32)
    weights, biases = init_params(layers, key)

    u_ref = _reference_forward(x, y, weights, biases)

    # 1) Default path: small N -> single grid step, pure f32 (module numerics).
    u = jax.block_until_ready(pinn_poisson_2d_forward(x, y, weights, biases))
    assert u.shape == (n_points, layers[-1])
    assert jnp.allclose(u, u_ref, atol=1e-5, rtol=1e-5)

    # 2) Multi-tile "parallel" grid path (forced small tiles just to exercise
    #    the grid > 1 / megacore code path at demo size).
    u_tiled = jax.block_until_ready(
        pinn_poisson_2d_forward(x, y, weights, biases, force_tile_n=256))
    assert jnp.allclose(u_tiled, u_ref, atol=1e-5, rtol=1e-5)

    # 3) bf16 tanh + bf16 MXU inputs (v6e/v7x fast path; f32 accumulation).
    u_bf16 = jax.block_until_ready(
        pinn_poisson_2d_forward(x, y, weights, biases, use_bf16=True))
    assert float(jnp.max(jnp.abs(u_bf16 - u_ref))) < 5e-2

    # TODO(synk): loss_PDE/test_PDE need second derivatives w.r.t. x, y through
    # this kernel; pallas_call has no automatic VJP on TPU, so that path needs
    # a custom_vjp (ideally fusing the residual so activations stay in VMEM).
    print("KERNEL_OK")
</pallas_src>

<mosaic_0001>
module attributes {stable_mosaic.version = 11 : i64} {
  func.func @_pinn_mlp_kernel(%arg0: i32, %arg1: memref<1x1024xf32, #tpu.memory_space<vmem>>, %arg2: memref<1x1024xf32, #tpu.memory_space<vmem>>, %arg3: memref<32x1xf32, #tpu.memory_space<vmem>>, %arg4: memref<32x1xf32, #tpu.memory_space<vmem>>, %arg5: memref<32x1xf32, #tpu.memory_space<vmem>>, %arg6: memref<32x32xf32, #tpu.memory_space<vmem>>, %arg7: memref<32x1xf32, #tpu.memory_space<vmem>>, %arg8: memref<1x32xf32, #tpu.memory_space<vmem>>, %arg9: memref<1x1xf32, #tpu.memory_space<vmem>>, %arg10: memref<1x1024xf32, #tpu.memory_space<vmem>>) attributes {dimension_semantics = [#tpu.dimension_semantics<arbitrary>], iteration_bounds = array<i64: 1>, scalar_prefetch = 0 : i64, scratch_operands = 0 : i64, tpu.core_type = #tpu.core_type<tc>, window_params = [{transform_indices = @transform_0, window_bounds = array<i64: 1, 1024>}, {transform_indices = @transform_1, window_bounds = array<i64: 1, 1024>}, {pipeline_mode = #tpu.pipeline_mode<synchronous>, transform_indices = @transform_2, window_bounds = array<i64: 32, 1>}, {pipeline_mode = #tpu.pipeline_mode<synchronous>, transform_indices = @transform_3, window_bounds = array<i64: 32, 1>}, {pipeline_mode = #tpu.pipeline_mode<synchronous>, transform_indices = @transform_4, window_bounds = array<i64: 32, 1>}, {pipeline_mode = #tpu.pipeline_mode<synchronous>, transform_indices = @transform_5, window_bounds = array<i64: 32, 32>}, {pipeline_mode = #tpu.pipeline_mode<synchronous>, transform_indices = @transform_6, window_bounds = array<i64: 32, 1>}, {pipeline_mode = #tpu.pipeline_mode<synchronous>, transform_indices = @transform_7, window_bounds = array<i64: 1, 32>}, {pipeline_mode = #tpu.pipeline_mode<synchronous>, transform_indices = @transform_8, window_bounds = array<i64: 1, 1>}, {transform_indices = @transform_9, window_bounds = array<i64: 1, 1024>}]} {
    %c0 = arith.constant 0 : index
    %c0_0 = arith.constant 0 : index
    %0 = vector.load %arg3[%c0, %c0_0] : memref<32x1xf32, #tpu.memory_space<vmem>>, vector<32x1xf32>
    %1 = vector.shape_cast %0 : vector<32x1xf32> to vector<32x1xf32>
    %2 = vector.broadcast %1 : vector<32x1xf32> to vector<32x512xf32>
    %c0_1 = arith.constant 0 : index
    %c0_2 = arith.constant 0 : index
    %3 = vector.load %arg4[%c0_1, %c0_2] : memref<32x1xf32, #tpu.memory_space<vmem>>, vector<32x1xf32>
    %4 = vector.shape_cast %3 : vector<32x1xf32> to vector<32x1xf32>
    %5 = vector.broadcast %4 : vector<32x1xf32> to vector<32x512xf32>
    %c0_3 = arith.constant 0 : index
    %c0_4 = arith.constant 0 : index
    %6 = vector.load %arg5[%c0_3, %c0_4] : memref<32x1xf32, #tpu.memory_space<vmem>>, vector<32x1xf32>
    %7 = vector.shape_cast %6 : vector<32x1xf32> to vector<32x1xf32>
    %8 = vector.broadcast %7 : vector<32x1xf32> to vector<32x512xf32>
    %c0_5 = arith.constant 0 : index
    %c0_6 = arith.constant 0 : index
    %9 = vector.load %arg6[%c0_5, %c0_6] : memref<32x32xf32, #tpu.memory_space<vmem>>, vector<32x32xf32>
    %c0_7 = arith.constant 0 : index
    %c0_8 = arith.constant 0 : index
    %10 = vector.load %arg8[%c0_7, %c0_8] : memref<1x32xf32, #tpu.memory_space<vmem>>, vector<1x32xf32>
    %c0_9 = arith.constant 0 : index
    %c0_10 = arith.constant 0 : index
    %11 = vector.load %arg7[%c0_9, %c0_10] : memref<32x1xf32, #tpu.memory_space<vmem>>, vector<32x1xf32>
    %12 = vector.shape_cast %11 : vector<32x1xf32> to vector<32x1xf32>
    %13 = vector.broadcast %12 : vector<32x1xf32> to vector<32x512xf32>
    %c0_11 = arith.constant 0 : index
    %c0_12 = arith.constant 0 : index
    %14 = vector.load %arg9[%c0_11, %c0_12] : memref<1x1xf32, #tpu.memory_space<vmem>>, vector<1x1xf32>
    %15 = vector.shape_cast %14 : vector<1x1xf32> to vector<1x1xf32>
    %16 = vector.broadcast %15 : vector<1x1xf32> to vector<1x512xf32>
    %c0_i32 = arith.constant 0 : i32
    %c512_i32 = arith.constant 512 : i32
    %17 = arith.muli %c0_i32, %c512_i32 : i32
    %18 = tpu.assume_multiple %17, 128 : i32
    %c0_13 = arith.constant 0 : index
    %19 = arith.index_cast %18 : i32 to index
    %20 = vector.load %arg1[%c0_13, %19] : memref<1x1024xf32, #tpu.memory_space<vmem>>, vector<1x512xf32>
    %c0_14 = arith.constant 0 : index
    %21 = arith.index_cast %18 : i32 to index
    %22 = vector.load %arg2[%c0_14, %21] : memref<1x1024xf32, #tpu.memory_space<vmem>>, vector<1x512xf32>
    %23 = vector.broadcast %20 : vector<1x512xf32> to vector<32x512xf32>
    %24 = arith.mulf %2, %23 : vector<32x512xf32>
    %25 = vector.broadcast %22 : vector<1x512xf32> to vector<32x512xf32>
    %26 = arith.mulf %5, %25 : vector<32x512xf32>
    %27 = arith.addf %24, %26 : vector<32x512xf32>
    %28 = arith.addf %27, %8 : vector<32x512xf32>
    %29 = math.tanh %28 : vector<32x512xf32>
    %cst = arith.constant dense<0.000000e+00> : vector<32x512xf32>
    %30 = tpu.matmul %9, %29, %cst {dimension_numbers = #tpu.dot_dimension_numbers<[1], [0], [0], [1], [0, 0, 1, 1], [], []>} : vector<32x32xf32>, vector<32x512xf32>, vector<32x512xf32> -> vector<32x512xf32>
    %31 = arith.addf %30, %13 : vector<32x512xf32>
    %32 = math.tanh %31 : vector<32x512xf32>
    %cst_15 = arith.constant dense<0.000000e+00> : vector<1x512xf32>
    %33 = tpu.matmul %10, %32, %cst_15 {dimension_numbers = #tpu.dot_dimension_numbers<[1], [0], [0], [1], [0, 0, 1, 1], [], []>} : vector<1x32xf32>, vector<32x512xf32>, vector<1x512xf32> -> vector<1x512xf32>
    %34 = arith.addf %33, %16 : vector<1x512xf32>
    %c0_16 = arith.constant 0 : index
    %35 = arith.index_cast %18 : i32 to index
    %36 = vector.load %arg10[%c0_16, %35] : memref<1x1024xf32, #tpu.memory_space<vmem>>, vector<1x512xf32>
    tpu.vector_store %arg10[%c0_16, %35], %34 {strides = array<i32>} : memref<1x1024xf32, #tpu.memory_space<vmem>>, vector<1x512xf32>,
    %c1_i32 = arith.constant 1 : i32
    %c512_i32_17 = arith.constant 512 : i32
    %37 = arith.muli %c1_i32, %c512_i32_17 : i32
    %38 = tpu.assume_multiple %37, 128 : i32
    %c0_18 = arith.constant 0 : index
    %39 = arith.index_cast %38 : i32 to index
    %40 = vector.load %arg1[%c0_18, %39] : memref<1x1024xf32, #tpu.memory_space<vmem>>, vector<1x512xf32>
    %c0_19 = arith.constant 0 : index
    %41 = arith.index_cast %38 : i32 to index
    %42 = vector.load %arg2[%c0_19, %41] : memref<1x1024xf32, #tpu.memory_space<vmem>>, vector<1x512xf32>
    %43 = vector.broadcast %40 : vector<1x512xf32> to vector<32x512xf32>
    %44 = arith.mulf %2, %43 : vector<32x512xf32>
    %45 = vector.broadcast %42 : vector<1x512xf32> to vector<32x512xf32>
    %46 = arith.mulf %5, %45 : vector<32x512xf32>
    %47 = arith.addf %44, %46 : vector<32x512xf32>
    %48 = arith.addf %47, %8 : vector<32x512xf32>
    %49 = math.tanh %48 : vector<32x512xf32>
    %cst_20 = arith.constant dense<0.000000e+00> : vector<32x512xf32>
    %50 = tpu.matmul %9, %49, %cst_20 {dimension_numbers = #tpu.dot_dimension_numbers<[1], [0], [0], [1], [0, 0, 1, 1], [], []>} : vector<32x32xf32>, vector<32x512xf32>, vector<32x512xf32> -> vector<32x512xf32>
    %51 = arith.addf %50, %13 : vector<32x512xf32>
    %52 = math.tanh %51 : vector<32x512xf32>
    %cst_21 = arith.constant dense<0.000000e+00> : vector<1x512xf32>
    %53 = tpu.matmul %10, %52, %cst_21 {dimension_numbers = #tpu.dot_dimension_numbers<[1], [0], [0], [1], [0, 0, 1, 1], [], []>} : vector<1x32xf32>, vector<32x512xf32>, vector<1x512xf32> -> vector<1x512xf32>
    %54 = arith.addf %53, %16 : vector<1x512xf32>
    %c0_22 = arith.constant 0 : index
    %55 = arith.index_cast %38 : i32 to index
    %56 = vector.load %arg10[%c0_22, %55] : memref<1x1024xf32, #tpu.memory_space<vmem>>, vector<1x512xf32>
    tpu.vector_store %arg10[%c0_22, %55], %54 {strides = array<i32>} : memref<1x1024xf32, #tpu.memory_space<vmem>>, vector<1x512xf32>,
    %c2_i32 = arith.constant 2 : i32
    return
  }
  func.func @transform_0(%arg0: i32) -> (i32, i32) {
    %c0_i32 = arith.constant 0 : i32
    %c0_i32_0 = arith.constant 0 : i32
    return %c0_i32, %arg0 : i32, i32
  }
  func.func @transform_1(%arg0: i32) -> (i32, i32) {
    %c0_i32 = arith.constant 0 : i32
    %c0_i32_0 = arith.constant 0 : i32
    return %c0_i32, %arg0 : i32, i32
  }
  func.func @transform_2(%arg0: i32) -> (i32, i32) {
    %c0_i32 = arith.constant 0 : i32
    %c0_i32_0 = arith.constant 0 : i32
    %c0_i32_1 = arith.constant 0 : i32
    return %c0_i32, %c0_i32_0 : i32, i32
  }
  func.func @transform_3(%arg0: i32) -> (i32, i32) {
    %c0_i32 = arith.constant 0 : i32
    %c0_i32_0 = arith.constant 0 : i32
    %c0_i32_1 = arith.constant 0 : i32
    return %c0_i32, %c0_i32_0 : i32, i32
  }
  func.func @transform_4(%arg0: i32) -> (i32, i32) {
    %c0_i32 = arith.constant 0 : i32
    %c0_i32_0 = arith.constant 0 : i32
    %c0_i32_1 = arith.constant 0 : i32
    return %c0_i32, %c0_i32_0 : i32, i32
  }
  func.func @transform_5(%arg0: i32) -> (i32, i32) {
    %c0_i32 = arith.constant 0 : i32
    %c0_i32_0 = arith.constant 0 : i32
    %c0_i32_1 = arith.constant 0 : i32
    return %c0_i32, %c0_i32_0 : i32, i32
  }
  func.func @transform_6(%arg0: i32) -> (i32, i32) {
    %c0_i32 = arith.constant 0 : i32
    %c0_i32_0 = arith.constant 0 : i32
    %c0_i32_1 = arith.constant 0 : i32
    return %c0_i32, %c0_i32_0 : i32, i32
  }
  func.func @transform_7(%arg0: i32) -> (i32, i32) {
    %c0_i32 = arith.constant 0 : i32
    %c0_i32_0 = arith.constant 0 : i32
    %c0_i32_1 = arith.constant 0 : i32
    return %c0_i32, %c0_i32_0 : i32, i32
  }
  func.func @transform_8(%arg0: i32) -> (i32, i32) {
    %c0_i32 = arith.constant 0 : i32
    %c0_i32_0 = arith.constant 0 : i32
    %c0_i32_1 = arith.constant 0 : i32
    return %c0_i32, %c0_i32_0 : i32, i32
  }
  func.func @transform_9(%arg0: i32) -> (i32, i32) {
    %c0_i32 = arith.constant 0 : i32
    %c0_i32_0 = arith.constant 0 : i32
    return %c0_i32, %arg0 : i32, i32
  }
}

</mosaic_0001>

<bundles_post_ra>
// kernel: tpu_custom_call.1
= control target key start
LH: loop header
LB: loop body
LE: loop exit
PB: predicated region body
PF: predicated region fallthrough
CT: control target
= control target key end

     0   :  { %s1521_s0 = inlined_call_operand.vmem [shape: f32[1,1024], index: 0, kind: input, shape index: {}]   ;;  %s1522_s1 = inlined_call_operand.vmem [shape: f32[1,1024], index: 1, kind: input, shape index: {}]   ;;  %s1523_s2 = inlined_call_operand.vmem [shape: f32[32,1], index: 2, kind: input, shape index: {}]   ;;  %s1524_s3 = inlined_call_operand.vmem [shape: f32[32,1], index: 3, kind: input, shape index: {}]   ;;  %s1525_s4 = inlined_call_operand.vmem [shape: f32[32,1], index: 4, kind: input, shape index: {}]   ;;  %s1526_s5 = inlined_call_operand.vmem [shape: f32[32,32], index: 5, kind: input, shape index: {}]   ;;  %s1527_s6 = inlined_call_operand.vmem [shape: f32[32,1], index: 6, kind: input, shape index: {}]   ;;  %s1528_s7 = inlined_call_operand.vmem [shape: f32[1,32], index: 7, kind: input, shape index: {}]   ;;  %s1529_s8 = inlined_call_operand.<no memory space> [shape: f32[1,1], index: 8, kind: input, shape index: {}]   ;;  %s1530_s9 = inlined_call_operand.hbm [shape: f32[1,1024], index: 9, kind: output, shape index: {}]  }
   0x1   :  { %v14_v0 = vstv %s1529_s8 }
   0x2   :  { %15 = vst [vmem:[#allocation2] sm:$0x1] %v14_v0 }
   0x3   :  { %v38_v1 = vld [vmem:[%s1523_s2 + $0x18] sm:$0xff]  ;;  %v37_v2 = vld [vmem:[%s1523_s2 + $0x10] sm:$0xff]  ;;  %v36_v3 = vld [vmem:[%s1523_s2 + $0x8] sm:$0xff]  ;;  %v1034_v4 = vmov 0  }
   0x4   :  { %879 = vset.pattern.permute.xlu2 %v1034_v4  ;;  %878 = vset.pattern.permute.xlu1 %v1034_v4 }
   0x5   :  { %877 = vset.pattern.permute.xlu0 %v1034_v4  ;;  %51 = vperm.xlu1 %878, %v37_v2  }
   0x6   :  { %56 = vperm.xlu0 %877, %v38_v1   ;;  %46 = vperm.xlu2 %879, %v36_v3  }
   0x7   :  { %16 = vsyncpa [#allocation4], 0  ;;  %v61_v5 = vld [vmem:[%s1524_s3 + $0x10] sm:$0xff]  ;;  %v62_v6 = vld [vmem:[%s1524_s3 + $0x18] sm:$0xff]  ;;  %vm243_vm0 = vcmask 261120   ;;  %vm478_vm1 = vcmask 1040384  }
   0x8   :  { %v60_v7 = vld [vmem:[%s1524_s3 + $0x8] sm:$0xff]  ;;  %v35_v8 = vld [vmem:[%s1523_s2] sm:$0xff]  ;;  %v86_v9 = vld [vmem:[%s1525_s4 + $0x18] sm:$0xff]  ;;  %vm480_vm2 = vcmask 1042434   ;;  %vm482_vm3 = vcmask 1041408   ;;  %s824_s12 = sshll.u32 %s1530_s9, 4  ;;  %s825_s12 = int_to_ptr.hbm [resolvable:$true] %s824_s12 }
   0x9   :  { %v59_v10 = vld [vmem:[%s1524_s3] sm:$0xff]  ;;  %v84_v11 = vld [vmem:[%s1525_s4 + $0x8] sm:$0xff]  ;;  %v85_v12 = vld [vmem:[%s1525_s4 + $0x10] sm:$0xff] }
   0xa   :  { %v83_v13 = vld [vmem:[%s1525_s4] sm:$0xff]  ;;  %v114_v14 = vld [vmem:[%s1527_s6 + $0x10] sm:$0xff]  ;;  %v115_v15 = vld [vmem:[%s1527_s6 + $0x18] sm:$0xff] }
   0xb   :  { %v113_v16 = vld [vmem:[%s1527_s6 + $0x8] sm:$0xff]  ;;  %v136_v17 = vld [vmem:[#allocation2] sm:$0x1]  ;;  %v854_v20 = vld [vmem:[%s1522_s1 + $0x4] sm:$0xf] }
   0xc   :  { %v112_v18 = vld [vmem:[%s1527_s6] sm:$0xff]  ;;  %v1143_v22 = vperm.slane %v854_v20, 0  ;;  %v1145_v23 = vperm.slane %v854_v20, 1  ;;  %v1155_v31 = vperm.slane %v854_v20, 2  ;;  %v1161_v34 = vperm.slane %v854_v20, 3 }
   0xd   :  { %75 = vperm.xlu1 %878, %v61_v5   ;;  %v853_v21 = vld [vmem:[%s1521_s0 + $0x4] sm:$0xf]  ;;  %v144_v37 = vld [vmem:[%s1522_s1] sm:$0xf] }
   0xe   :  { %80 = vperm.xlu0 %877, %v62_v6   ;;  %70 = vperm.xlu2 %879, %v60_v7   ;;  %v1147_v24 = vperm.slane %v853_v21, 0  ;;  %v1149_v25 = vperm.slane %v853_v21, 1  ;;  %v1163_v35 = vperm.slane %v853_v21, 2  ;;  %v1165_v36 = vperm.slane %v853_v21, 3  ;;  %v143_v38 = vld [vmem:[%s1521_s0] sm:$0xf] }
   0xf   :  { %v171_v43 = vperm.slane %v144_v37, 0  ;;  %v172_v44 = vperm.slane %v144_v37, 1  ;;  %v173_v45 = vperm.slane %v144_v37, 2  ;;  %v1179_v47 = vperm.slane %v143_v38, 0 }
  0x10   :  { %v1181_v48 = vperm.slane %v143_v38, 1  ;;  %v174_v49 = vperm.slane %v144_v37, 3  ;;  %v1185_v51 = vperm.slane %v143_v38, 2  ;;  %v1187_v53 = vperm.slane %v143_v38, 3 }
  0x15   :  { %41 = vperm.xlu1 %878, %v35_v8  }
  0x16   :  { %104 = vperm.xlu0 %877, %v86_v9   ;;  %65 = vperm.xlu2 %879, %v59_v10  }
  0x1d   :  { %94 = vperm.xlu1 %878, %v84_v11  }
  0x1e   :  { %99 = vperm.xlu0 %877, %v85_v12   ;;  %89 = vperm.xlu2 %879, %v83_v13  }
  0x25   :  { %128 = vperm.xlu1 %878, %v114_v14  }
  0x26   :  { %133 = vperm.xlu0 %877, %v115_v15   ;;  %123 = vperm.xlu2 %879, %v113_v16  }
  0x2d   :  { %139 = vperm.xlu1 %878, %v136_v17  }
  0x2e   :  { %118 = vperm.xlu0 %877, %v112_v18  }
  0x60   :  { %v47_v19 = vpop.permute.xlu2 %46 }
  0x61   :  { %v507_v27 = vmul.f32 %v1147_v24, %v47_v19  ;;  %v508_v29 = vmul.f32 %v1149_v25, %v47_v19  ;;  %v509_v39 = vmul.f32 %v1163_v35, %v47_v19  ;;  %v510_v41 = vmul.f32 %v1165_v36, %v47_v19 }
  0x62   :  { %v158_v54 = vmul.f32 %v1179_v47, %v47_v19  ;;  %v159_v55 = vmul.f32 %v1181_v48, %v47_v19  ;;  %v160_v59 = vmul.f32 %v1185_v51, %v47_v19  ;;  %v161_v61 = vmul.f32 %v1187_v53, %v47_v19 }
  0x68   :  { %v71_v26 = vpop.permute.xlu2 %70 }
  0x69   :  { %v532_v28 = vmul.f32 %v1143_v22, %v71_v26  ;;  %v533_v30 = vmul.f32 %v1145_v23, %v71_v26  ;;  %v534_v40 = vmul.f32 %v1155_v31, %v71_v26  ;;  %v535_v42 = vmul.f32 %v1161_v34, %v71_v26 }
  0x6a   :  { %v183_v57 = vmul.f32 %v171_v43, %v71_v26  ;;  %v184_v58 = vmul.f32 %v172_v44, %v71_v26  ;;  %v185_v60 = vmul.f32 %v173_v45, %v71_v26  ;;  %v186_v62 = vmul.f32 %v174_v49, %v71_v26 }
  0x6b   :  { %v1157_v32 = vadd.f32 %v532_v28, %v507_v27  ;;  %v1159_v33 = vadd.f32 %v533_v30, %v508_v29  ;;  %v1177_v46 = vadd.f32 %v534_v40, %v509_v39  ;;  %v1183_v50 = vadd.f32 %v535_v42, %v510_v41 }
  0x6c   :  { %v1195_v0 = vadd.f32 %v183_v57, %v158_v54  ;;  %v1197_v1 = vadd.f32 %v184_v58, %v159_v55  ;;  %v1199_v2 = vadd.f32 %v185_v60, %v160_v59  ;;  %v1201_v3 = vadd.f32 %v186_v62, %v161_v61 }
  0x6d   :  { %1532 = vst [vmem:[#allocation6_spill] sm:$0xff] %v1183_v50 }
  0x70   :  { %v1193_v63 = vpop.permute.xlu2 %65 }
  0x71   :  { %1533 = vst [vmem:[#allocation7_spill] sm:$0xff] %v1193_v63  ;;  %v1204_v4 = vmul.f32 %v171_v43, %v1193_v63  ;;  %v1207_v5 = vmul.f32 %v172_v44, %v1193_v63  ;;  %v1210_v6 = vmul.f32 %v173_v45, %v1193_v63  ;;  %v1213_v7 = vmul.f32 %v174_v49, %v1193_v63 }
  0x72   :  { %v1217_v8 = vmul.f32 %v1143_v22, %v1193_v63  ;;  %v1221_v9 = vmul.f32 %v1145_v23, %v1193_v63  ;;  %v1225_v10 = vmul.f32 %v1155_v31, %v1193_v63 }
  0x74   :  { %1534 = vst [vmem:[#allocation8_spill] sm:$0xff] %v1225_v10 }
  0x77   :  { %v52_v52 = vpop.permute.xlu1 %51 }
  0x78   :  { %v57_v56 = vpop.permute.xlu0 %56  ;;  %v162_v12 = vmul.f32 %v1179_v47, %v52_v52  ;;  %v163_v13 = vmul.f32 %v1181_v48, %v52_v52  ;;  %v164_v14 = vmul.f32 %v1185_v51, %v52_v52  ;;  %v165_v15 = vmul.f32 %v1187_v53, %v52_v52 }
  0x79   :  { %v515_v16 = vmul.f32 %v1147_v24, %v57_v56  ;;  %v516_v17 = vmul.f32 %v1149_v25, %v57_v56  ;;  %v517_v18 = vmul.f32 %v1163_v35, %v57_v56  ;;  %v518_v19 = vmul.f32 %v1165_v36, %v57_v56 }
  0x7a   :  { %v166_v54 = vmul.f32 %v1179_v47, %v57_v56  ;;  %v167_v55 = vmul.f32 %v1181_v48, %v57_v56  ;;  %v168_v57 = vmul.f32 %v1185_v51, %v57_v56  ;;  %v169_v58 = vmul.f32 %v1187_v53, %v57_v56 }
  0x7b   :  { %v511_v59 = vmul.f32 %v1147_v24, %v52_v52  ;;  %v512_v60 = vmul.f32 %v1149_v25, %v52_v52  ;;  %v513_v61 = vmul.f32 %v1163_v35, %v52_v52  ;;  %v514_v62 = vmul.f32 %v1165_v36, %v52_v52 }
  0x7f   :  { %v76_v11 = vpop.permute.xlu1 %75 }
  0x80   :  { %v81_v20 = vpop.permute.xlu0 %80  ;;  %v536_v50 = vmul.f32 %v1143_v22, %v76_v11 }
  0x81   :  { %v540_v21 = vmul.f32 %v1143_v22, %v81_v20  ;;  %v541_v26 = vmul.f32 %v1145_v23, %v81_v20  ;;  %v542_v27 = vmul.f32 %v1155_v31, %v81_v20  ;;  %v543_v28 = vmul.f32 %v1161_v34, %v81_v20 }
  0x82   :  { %v191_v29 = vmul.f32 %v171_v43, %v81_v20  ;;  %v192_v30 = vmul.f32 %v172_v44, %v81_v20  ;;  %v193_v37 = vmul.f32 %v173_v45, %v81_v20  ;;  %v194_v38 = vmul.f32 %v174_v49, %v81_v20 }
  0x83   :  { %v556_v39 = vadd.f32 %v540_v21, %v515_v16  ;;  %v557_v40 = vadd.f32 %v541_v26, %v516_v17  ;;  %v558_v41 = vadd.f32 %v542_v27, %v517_v18  ;;  %v559_v42 = vadd.f32 %v543_v28, %v518_v19 }
  0x84   :  { %v187_v16 = vmul.f32 %v171_v43, %v76_v11  ;;  %v188_v17 = vmul.f32 %v172_v44, %v76_v11  ;;  %v189_v18 = vmul.f32 %v173_v45, %v76_v11  ;;  %v190_v19 = vmul.f32 %v174_v49, %v76_v11 }
  0x85   :  { %v207_v21 = vadd.f32 %v191_v29, %v166_v54  ;;  %v208_v26 = vadd.f32 %v192_v30, %v167_v55  ;;  %v209_v27 = vadd.f32 %v193_v37, %v168_v57  ;;  %v210_v28 = vadd.f32 %v194_v38, %v169_v58 }
  0x86   :  { %v537_v43 = vmul.f32 %v1145_v23, %v76_v11  ;;  %v203_v29 = vadd.f32 %v187_v16, %v162_v12  ;;  %v204_v30 = vadd.f32 %v188_v17, %v163_v13  ;;  %v205_v22 = vadd.f32 %v189_v18, %v164_v14 }
  0x87   :  { %v1247_v20 = vpop.permute.xlu1 %41  ;;  %v538_v23 = vmul.f32 %v1155_v31, %v76_v11  ;;  %v539_v38 = vmul.f32 %v1161_v34, %v76_v11 }
  0x88   :  { %v105_v63 = vpop.permute.xlu0 %104  ;;  %v154_v56 = vmul.f32 %v1179_v47, %v1247_v20  ;;  %v155_v10 = vmul.f32 %v1181_v48, %v1247_v20  ;;  %v156_v47 = vmul.f32 %v1185_v51, %v1247_v20  ;;  %v157_v48 = vmul.f32 %v1187_v53, %v1247_v20 }
  0x89   :  { %v1255_v44 = vadd.f32 %v556_v39, %v105_v63  ;;  %v1257_v45 = vadd.f32 %v557_v40, %v105_v63  ;;  %v1259_v49 = vadd.f32 %v558_v41, %v105_v63  ;;  %v1261_v52 = vadd.f32 %v559_v42, %v105_v63 }
  0x8a   :  { %v223_v37 = vadd.f32 %v207_v21, %v105_v63  ;;  %v224_v39 = vadd.f32 %v208_v26, %v105_v63  ;;  %v206_v40 = vadd.f32 %v190_v19, %v165_v15  ;;  %v552_v41 = vadd.f32 %v536_v50, %v511_v59 }
  0x8b   :  { %v553_v54 = vadd.f32 %v537_v43, %v512_v60  ;;  %v225_v42 = vadd.f32 %v209_v27, %v105_v63  ;;  %v226_v55 = vadd.f32 %v210_v28, %v105_v63  ;;  %v195_v12 = vadd.f32 %v1204_v4, %v154_v56  ;;  %v1537_v28 = vld [vmem:[#allocation7_spill] sm:$0xff] }
  0x8c   :  { %v196_v13 = vadd.f32 %v1207_v5, %v155_v10  ;;  %v197_v51 = vadd.f32 %v1210_v6, %v156_v47  ;;  %v198_v53 = vadd.f32 %v1213_v7, %v157_v48  ;;  %v503_v14 = vmul.f32 %v1147_v24, %v1247_v20 }
  0x8d   :  { %v504_v31 = vmul.f32 %v1149_v25, %v1247_v20  ;;  %880 = vtanh.f32 %v223_v37  ;;  %v554_v50 = vadd.f32 %v538_v23, %v513_v61  ;;  %v555_v15 = vadd.f32 %v539_v38, %v514_v62 }
  0x8e   :  { %v505_v63 = vmul.f32 %v1163_v35, %v1247_v20  ;;  %882 = vtanh.f32 %v224_v39  ;;  %v531_v56 = vmul.f32 %v1161_v34, %v1537_v28 }
  0x8f   :  { %v95_v11 = vpop.permute.xlu1 %94  ;;  %884 = vtanh.f32 %v225_v42 }
  0x90   :  { %v100_v4 = vpop.permute.xlu0 %99  ;;  %v215_v5 = vadd.f32 %v1195_v0, %v95_v11  ;;  %v216_v6 = vadd.f32 %v1197_v1, %v95_v11  ;;  %v217_v7 = vadd.f32 %v1199_v2, %v95_v11  ;;  %886 = vtanh.f32 %v226_v55 }
  0x91   :  { %v219_v24 = vadd.f32 %v203_v29, %v100_v4  ;;  %v220_v10 = vadd.f32 %v204_v30, %v100_v4  ;;  %v221_v57 = vadd.f32 %v205_v22, %v100_v4  ;;  %v222_v25 = vadd.f32 %v206_v40, %v100_v4 }
  0x92   :  { %v218_v58 = vadd.f32 %v1201_v3, %v95_v11  ;;  %v1283_v59 = vadd.f32 %v552_v41, %v100_v4  ;;  %v1285_v35 = vadd.f32 %v553_v54, %v100_v4  ;;  %v1288_v60 = vadd.f32 %v1157_v32, %v95_v11  ;;  %v90_v3 = vpop.permute.xlu2 %89  ;;  %v1535_v32 = vld [vmem:[#allocation6_spill] sm:$0xff]  ;;  %v1321_v54 = vld [vmem:[%s1526_s5] sm:$0xff] }
  0x93   :  { %888 = vtanh.f32 %v219_v24  ;;  %v1291_v0 = vadd.f32 %v1159_v33, %v95_v11  ;;  %v544_v1 = vadd.f32 %v1217_v8, %v503_v14  ;;  %v545_v2 = vadd.f32 %v1221_v9, %v504_v31  ;;  %v881_v62 = vpop.eup %880  ;;  %v1536_v9 = vld [vmem:[#allocation8_spill] sm:$0xff] }
  0x94   :  { %890 = vtanh.f32 %v220_v10  ;;  %v1295_v61 = vadd.f32 %v554_v50, %v100_v4  ;;  %v1297_v16 = vadd.f32 %v555_v15, %v100_v4  ;;  %v1300_v17 = vadd.f32 %v1177_v46, %v95_v11  ;;  %v883_v33 = vpop.eup %882  ;;  %268 = vmatpush.msra.mxu0 %v881_v62  ;;  %v1360_v14 = vld [vmem:[%s1526_s5 + $0x18] sm:$0xff] }
  0x95   :  { %892 = vtanh.f32 %v221_v57  ;;  %v1303_v18 = vadd.f32 %v1535_v32, %v95_v11  ;;  %v1305_v19 = vadd.f32 %v544_v1, %v90_v3  ;;  %v1307_v8 = vadd.f32 %v545_v2, %v90_v3  ;;  %v885_v26 = vpop.eup %884  ;;  %297 = vmatpush.msra.mxu1 %v883_v33 }
  0x96   :  { %894 = vtanh.f32 %v222_v25  ;;  %v546_v21 = vadd.f32 %v1536_v9, %v505_v63  ;;  %v211_v27 = vadd.f32 %v195_v12, %v90_v3  ;;  %v506_v46 = vmul.f32 %v1165_v36, %v1247_v20  ;;  %v887_v43 = vpop.eup %886  ;;  %326 = vmatpush.msra.mxu2 %v885_v26 }
  0x97   :  { %896 = vtanh.f32 %v215_v5  ;;  %v212_v29 = vadd.f32 %v196_v13, %v90_v3  ;;  %355 = vmatpush.msra.mxu3 %v887_v43  ;;  %v213_v48 = vadd.f32 %v197_v51, %v90_v3  ;;  %v214_v23 = vadd.f32 %v198_v53, %v90_v3  ;;  %v1334_v51 = vld [vmem:[%s1526_s5 + $0x8] sm:$0xff]  ;;  %v1347_v53 = vld [vmem:[%s1526_s5 + $0x10] sm:$0xff] }
  0x98   :  { %898 = vtanh.f32 %v216_v6  ;;  %v1314_v30 = vadd.f32 %v546_v21, %v90_v3  ;;  %v547_v37 = vadd.f32 %v531_v56, %v506_v46  ;;  %v1374_v5 = vpop.permute.xlu0 %133 }
  0x99   :  { %v889_v47 = vpop.eup %888  ;;  %900 = vtanh.f32 %v217_v7 }
  0x9a   :  { %v891_v22 = vpop.eup %890  ;;  %269 = vmatpush.msra.mxu0 %v889_v47  ;;  %902 = vtanh.f32 %v218_v58  ;;  %v1316_v36 = vadd.f32 %v547_v37, %v90_v3  ;;  %v1393_v21 = vpop.permute.xlu2 %123 }
  0x9b   :  { %v893_v38 = vpop.eup %892  ;;  %298 = vmatpush.msra.mxu1 %v891_v22  ;;  %904 = vtanh.f32 %v211_v27 }
  0x9c   :  { %v895_v34 = vpop.eup %894  ;;  %327 = vmatpush.msra.mxu2 %v893_v38  ;;  %906 = vtanh.f32 %v212_v29 }
  0x9d   :  { %v897_v20 = vpop.eup %896  ;;  %356 = vmatpush.msra.mxu3 %v895_v34  ;;  %908 = vtanh.f32 %v213_v48 }
  0x9e   :  { %v899_v39 = vpop.eup %898  ;;  %270 = vmatpush.msra.mxu0 %v897_v20  ;;  %910 = vtanh.f32 %v214_v23 }
  0x9f   :  { %v901_v40 = vpop.eup %900  ;;  %299 = vmatpush.msra.mxu1 %v899_v39  ;;  %912 = vtanh.f32 %v1255_v44  ;;  %v1386_v44 = vpop.permute.xlu1 %128 }
  0xa0   :  { %v903_v41 = vpop.eup %902  ;;  %328 = vmatpush.msra.mxu2 %v901_v40  ;;  %914 = vtanh.f32 %v1257_v45  ;;  %v1378_v57 = vpop.permute.xlu0 %118 }
  0xa1   :  { %v905_v42 = vpop.eup %904  ;;  %357 = vmatpush.msra.mxu3 %v903_v41  ;;  %916 = vtanh.f32 %v1259_v49 }
  0xa2   :  { %v907_v55 = vpop.eup %906  ;;  %271 = vmatpush.msra.mxu0 %v905_v42  ;;  %918 = vtanh.f32 %v1283_v59 }
  0xa3   :  { %v909_v12 = vpop.eup %908  ;;  %300 = vmatpush.msra.mxu1 %v907_v55  ;;  %833 = vmatmul.msk.f32.vlgmr.msra.gmra.mxu0 %vm243_vm0, %v1321_v54  ;;  %920 = vtanh.f32 %v1285_v35 }
  0xa4   :  { %v911_v13 = vpop.eup %910  ;;  %329 = vmatpush.msra.mxu2 %v909_v12  ;;  %837 = vmatmul.msk.f32.vlgmr.msra.gmra.mxu1 %vm243_vm0, %v1321_v54  ;;  %922 = vtanh.f32 %v1288_v60 }
  0xa5   :  { %358 = vmatpush.msra.mxu3 %v911_v13  ;;  %841 = vmatmul.msk.f32.vlgmr.msra.gmra.mxu2 %vm243_vm0, %v1321_v54  ;;  %v1390_v49 = vpop.eup %912 }
  0xa6   :  { %845 = vmatmul.msk.f32.vlgmr.msra.gmra.mxu3 %vm243_vm0, %v1321_v54  ;;  %v915_v9 = vpop.eup %914 }
  0xa7   :  { %v1396_v26 = vpop.eup %916 }
  0xa8   :  { %v919_v27 = vpop.eup %918 }
  0xa9   :  { %v921_v60 = vpop.eup %920 }
  0xaa   :  { %v1400_v28 = vpop.eup %922 }
  0xab   :  { %834 = vmatmul.msk.f32.gmra.mxu0 %vm243_vm0, %v1334_v51 }
  0xac   :  { %838 = vmatmul.msk.f32.gmra.mxu1 %vm243_vm0, %v1334_v51 }
  0xad   :  { %842 = vmatmul.msk.f32.gmra.mxu2 %vm243_vm0, %v1334_v51 }
  0xae   :  { %846 = vmatmul.msk.f32.gmra.mxu3 %vm243_vm0, %v1334_v51 }
  0xb3   :  { %835 = vmatmul.msk.f32.gmra.mxu0 %vm243_vm0, %v1347_v53 }
  0xb4   :  { %839 = vmatmul.msk.f32.gmra.mxu1 %vm243_vm0, %v1347_v53 }
  0xb5   :  { %843 = vmatmul.msk.f32.gmra.mxu2 %vm243_vm0, %v1347_v53 }
  0xb6   :  { %847 = vmatmul.msk.f32.gmra.mxu3 %vm243_vm0, %v1347_v53 }
  0xbb   :  { %836 = vmatmul.msk.f32.gmra.mxu0 %vm243_vm0, %v1360_v14 }
  0xbc   :  { %840 = vmatmul.msk.f32.gmra.mxu1 %vm243_vm0, %v1360_v14 }
  0xbd   :  { %844 = vmatmul.msk.f32.gmra.mxu2 %vm243_vm0, %v1360_v14 }
  0xbe   :  { %848 = vmatmul.msk.f32.gmra.mxu3 %vm243_vm0, %v1360_v14 }
 0x120   :  { %v273_v31 = vpop.f32.mrf.mxu0 }
 0x121   :  { %v302_v11 = vpop.f32.mrf.mxu1  ;;  %v274_v25 = vadd.f32 %v273_v31, %v1378_v57 }
 0x122   :  { %v303_v58 = vadd.f32 %v302_v11, %v1378_v57 }
 0x123   :  { %924 = vtanh.f32 %v274_v25 }
 0x124   :  { %926 = vtanh.f32 %v303_v58 }
 0x128   :  { %v1370_v50 = vpop.f32.mrf.mxu2  ;;  %v276_v15 = vpop.f32.mrf.mxu0 }
 0x129   :  { %v1372_v63 = vpop.f32.mrf.mxu3  ;;  %v305_v4 = vpop.f32.mrf.mxu1  ;;  %v277_v35 = vadd.f32 %v276_v15, %v1393_v21  ;;  %v332_v42 = vadd.f32 %v1370_v50, %v1378_v57 }
 0x12a   :  { %v306_v46 = vadd.f32 %v305_v4, %v1393_v21  ;;  %v925_v43 = vpop.eup %924  ;;  %v361_v12 = vadd.f32 %v1372_v63, %v1378_v57 }
 0x12b   :  { %v927_v48 = vpop.eup %926 }
 0x130   :  { %v334_v6 = vpop.f32.mrf.mxu2  ;;  %v279_v7 = vpop.f32.mrf.mxu0 }
 0x131   :  { %v363_v24 = vpop.f32.mrf.mxu3  ;;  %v308_v10 = vpop.f32.mrf.mxu1  ;;  %v280_v33 = vadd.f32 %v279_v7, %v1386_v44  ;;  %v335_v20 = vadd.f32 %v334_v6, %v1393_v21 }
 0x132   :  { %v309_v59 = vadd.f32 %v308_v10, %v1386_v44  ;;  %v364_v40 = vadd.f32 %v363_v24, %v1393_v21 }
 0x138   :  { %v337_v1 = vpop.f32.mrf.mxu2  ;;  %v282_v2 = vpop.f32.mrf.mxu0 }
 0x139   :  { %v366_v62 = vpop.f32.mrf.mxu3  ;;  %v283_v3 = vadd.f32 %v282_v2, %v1374_v5  ;;  %v311_v32 = vpop.f32.mrf.mxu1  ;;  %v338_v37 = vadd.f32 %v337_v1, %v1386_v44 }
 0x13a   :  { %v312_v45 = vadd.f32 %v311_v32, %v1374_v5  ;;  %v367_v38 = vadd.f32 %v366_v62, %v1386_v44 }
 0x13b   :  { %928 = vtanh.f32 %v283_v3  ;;  %v485_v3 = vlaneseq }
 0x13c   :  { %930 = vtanh.f32 %v312_v45 }
 0x13d   :  { %932 = vtanh.f32 %v280_v33  ;;  %vm1476_vm4 = vcmp.lt.s32.totalorder %v485_v3, 512 }
 0x13e   :  { %934 = vtanh.f32 %v309_v59 }
 0x13f   :  { %936 = vtanh.f32 %v277_v35 }
 0x140   :  { %v340_v56 = vpop.f32.mrf.mxu2  ;;  %938 = vtanh.f32 %v306_v46 }
 0x141   :  { %v341_v29 = vadd.f32 %v340_v56, %v1374_v5  ;;  %v369_v47 = vpop.f32.mrf.mxu3  ;;  %v929_v23 = vpop.eup %928 }
 0x142   :  { %v370_v22 = vadd.f32 %v369_v47, %v1374_v5  ;;  %v931_v34 = vpop.eup %930  ;;  %403 = vmatpush.msrb.mxu0 %v929_v23 }
 0x143   :  { %940 = vtanh.f32 %v341_v29  ;;  %v933_v39 = vpop.eup %932  ;;  %423 = vmatpush.msrb.mxu1 %v931_v34 }
 0x144   :  { %942 = vtanh.f32 %v370_v22  ;;  %v935_v41 = vpop.eup %934  ;;  %404 = vmatpush.msrb.mxu0 %v933_v39 }
 0x145   :  { %944 = vtanh.f32 %v1291_v0  ;;  %v937_v55 = vpop.eup %936  ;;  %424 = vmatpush.msrb.mxu1 %v935_v41  ;;  %v1416_v0 = vld [vmem:[%s1528_s7] sm:$0x1]  ;;  %s1035_s7 = smov [#allocation3]  }
 0x146   :  { %946 = vtanh.f32 %v338_v37  ;;  %v939_v13 = vpop.eup %938  ;;  %405 = vmatpush.msrb.mxu0 %v937_v55  ;;  %s822_s10 = sshll.u32 %s1035_s7, 4  ;;  %s823_s10 = int_to_ptr.vmem [resolvable:$true] %s822_s10 }
 0x147   :  { %948 = vtanh.f32 %v367_v38  ;;  %425 = vmatpush.msrb.mxu1 %v939_v13 }
 0x148   :  { %950 = vtanh.f32 %v335_v20  ;;  %406 = vmatpush.msrb.mxu0 %v925_v43 }
 0x149   :  { %v941_v31 = vpop.eup %940  ;;  %952 = vtanh.f32 %v364_v40  ;;  %426 = vmatpush.msrb.mxu1 %v927_v48  ;;  %849 = vmatmul.msk.f32.vlgmr.msrb.gmra.mxu0 %vm243_vm0, %v1416_v0 }
 0x14a   :  { %v943_v11 = vpop.eup %942  ;;  %954 = vtanh.f32 %v332_v42  ;;  %443 = vmatpush.msrb.mxu2 %v941_v31  ;;  %850 = vmatmul.msk.f32.vlgmr.msrb.gmra.mxu1 %vm243_vm0, %v1416_v0 }
 0x14b   :  { %v945_v50 = vpop.eup %944  ;;  %956 = vtanh.f32 %v361_v12  ;;  %463 = vmatpush.msrb.mxu3 %v943_v11  ;;  %604 = vmatpush.msra.mxu0 %v1390_v49 }
 0x14c   :  { %v947_v15 = vpop.eup %946  ;;  %958 = vtanh.f32 %v1305_v19  ;;  %633 = vmatpush.msra.mxu1 %v915_v9 }
 0x14d   :  { %v949_v63 = vpop.eup %948  ;;  %960 = vtanh.f32 %v1307_v8  ;;  %444 = vmatpush.msrb.mxu2 %v947_v15  ;;  %605 = vmatpush.msra.mxu0 %v919_v27 }
 0x14e   :  { %v951_v4 = vpop.eup %950  ;;  %962 = vtanh.f32 %v1261_v52  ;;  %464 = vmatpush.msrb.mxu3 %v949_v63  ;;  %634 = vmatpush.msra.mxu1 %v921_v60 }
 0x14f   :  { %v953_v6 = vpop.eup %952  ;;  %964 = vtanh.f32 %v1295_v61  ;;  %445 = vmatpush.msrb.mxu2 %v951_v4  ;;  %606 = vmatpush.msra.mxu0 %v1400_v28 }
 0x150   :  { %v955_v7 = vpop.eup %954  ;;  %465 = vmatpush.msrb.mxu3 %v953_v6  ;;  %966 = vtanh.f32 %v1297_v16  ;;  %635 = vmatpush.msra.mxu1 %v945_v50 }
 0x151   :  { %v957_v19 = vpop.eup %956  ;;  %968 = vtanh.f32 %v1300_v17  ;;  %446 = vmatpush.msrb.mxu2 %v955_v7 }
 0x152   :  { %v959_v8 = vpop.eup %958  ;;  %466 = vmatpush.msrb.mxu3 %v957_v19  ;;  %970 = vtanh.f32 %v1303_v18  ;;  %851 = vmatmul.msk.f32.vlgmr.msrb.gmra.mxu2 %vm243_vm0, %v1416_v0 }
 0x153   :  { %v961_v52 = vpop.eup %960  ;;  %852 = vmatmul.msk.f32.vlgmr.msrb.gmra.mxu3 %vm243_vm0, %v1416_v0  ;;  %972 = vtanh.f32 %v1314_v30  ;;  %607 = vmatpush.msra.mxu0 %v959_v8 }
 0x154   :  { %v963_v61 = vpop.eup %962  ;;  %636 = vmatpush.msra.mxu1 %v961_v52  ;;  %974 = vtanh.f32 %v1316_v36  ;;  %662 = vmatpush.msra.mxu2 %v1396_v26 }
 0x155   :  { %v965_v16 = vpop.eup %964  ;;  %691 = vmatpush.msra.mxu3 %v963_v61  ;;  %855 = vmatmul.msk.f32.vlgmr.msra.gmra.mxu0 %vm243_vm0, %v1321_v54 }
 0x156   :  { %v967_v17 = vpop.eup %966  ;;  %859 = vmatmul.msk.f32.vlgmr.msra.gmra.mxu1 %vm243_vm0, %v1321_v54  ;;  %663 = vmatpush.msra.mxu2 %v965_v16 }
 0x157   :  { %v969_v18 = vpop.eup %968  ;;  %692 = vmatpush.msra.mxu3 %v967_v17 }
 0x158   :  { %v971_v30 = vpop.eup %970  ;;  %664 = vmatpush.msra.mxu2 %v969_v18 }
 0x159   :  { %v973_v24 = vpop.eup %972  ;;  %693 = vmatpush.msra.mxu3 %v971_v30 }
 0x15a   :  { %v975_v10 = vpop.eup %974  ;;  %665 = vmatpush.msra.mxu2 %v973_v24 }
 0x15b   :  { %694 = vmatpush.msra.mxu3 %v975_v10  ;;  %863 = vmatmul.msk.f32.vlgmr.msra.gmra.mxu2 %vm243_vm0, %v1321_v54 }
 0x15c   :  { %867 = vmatmul.msk.f32.vlgmr.msra.gmra.mxu3 %vm243_vm0, %v1321_v54 }
 0x15d   :  { %856 = vmatmul.msk.f32.gmra.mxu0 %vm243_vm0, %v1334_v51 }
 0x15e   :  { %860 = vmatmul.msk.f32.gmra.mxu1 %vm243_vm0, %v1334_v51 }
 0x163   :  { %864 = vmatmul.msk.f32.gmra.mxu2 %vm243_vm0, %v1334_v51 }
 0x164   :  { %868 = vmatmul.msk.f32.gmra.mxu3 %vm243_vm0, %v1334_v51  ;;  %v140_v51 = vpop.permute.xlu1 %139 }
 0x165   :  { %857 = vmatmul.msk.f32.gmra.mxu0 %vm243_vm0, %v1347_v53  ;;  %v1470_v25 = vperm.slane %v140_v51, 0 }
 0x166   :  { %861 = vmatmul.msk.f32.gmra.mxu1 %vm243_vm0, %v1347_v53 }
 0x16b   :  { %865 = vmatmul.msk.f32.gmra.mxu2 %vm243_vm0, %v1347_v53 }
 0x16c   :  { %869 = vmatmul.msk.f32.gmra.mxu3 %vm243_vm0, %v1347_v53 }
 0x16d   :  { %858 = vmatmul.msk.f32.gmra.mxu0 %vm243_vm0, %v1360_v14 }
 0x16e   :  { %862 = vmatmul.msk.f32.gmra.mxu1 %vm243_vm0, %v1360_v14 }
 0x173   :  { %866 = vmatmul.msk.f32.gmra.mxu2 %vm243_vm0, %v1360_v14 }
 0x174   :  { %870 = vmatmul.msk.f32.gmra.mxu3 %vm243_vm0, %v1360_v14 }
 0x1c6   :  { %v408_v36 = vpop.f32.mrf.mxu0 }
 0x1c7   :  { %v428_v54 = vpop.f32.mrf.mxu1  ;;  %v409_v14 = vadd.f32 %v408_v36, %v1470_v25 }
 0x1c8   :  { %v429_v58 = vadd.f32 %v428_v54, %v1470_v25 }
 0x1ca   :  { %v475_v32 = vrot.slane %v429_v58, 7 }
 0x1cc   :  { %v479_v26 = vsel %vm478_vm1, %v409_v14, %v475_v32 }
 0x1d2   :  { %v609_v53 = vpop.f32.mrf.mxu0 }
 0x1d3   :  { %v638_v1 = vpop.f32.mrf.mxu1  ;;  %v610_v55 = vadd.f32 %v609_v53, %v1378_v57 }
 0x1d4   :  { %v639_v12 = vadd.f32 %v638_v1, %v1378_v57 }
 0x1d5   :  { %v448_v2 = vpop.f32.mrf.mxu2 }
 0x1d6   :  { %v468_v62 = vpop.f32.mrf.mxu3  ;;  %v449_v45 = vadd.f32 %v448_v2, %v1470_v25 }
 0x1d7   :  { %v469_v49 = vadd.f32 %v468_v62, %v1470_v25 }
 0x1d8   :  { %v476_v33 = vrot.slane %v449_v45, 6 }
 0x1d9   :  { %v477_v9 = vrot.slane %v469_v49, 5 }
 0x1da   :  { %v612_v27 = vpop.f32.mrf.mxu0 }
 0x1db   :  { %v481_v35 = vsel %vm480_vm2, %v476_v33, %v477_v9  ;;  %v641_v46 = vpop.f32.mrf.mxu1  ;;  %v613_v39 = vadd.f32 %v612_v27, %v1393_v21 }
 0x1dc   :  { %v483_v60 = vsel %vm482_vm3, %v479_v26, %v481_v35  ;;  %v642_v40 = vadd.f32 %v641_v46, %v1393_v21 }
 0x1dd   :  { %489 = vst.msk [vmem:[#allocation3] sm:$0xf] %vm1476_vm4, %v483_v60 }
 0x1de   :  { %v667_v28 = vpop.f32.mrf.mxu2 }
 0x1df   :  { %v696_v56 = vpop.f32.mrf.mxu3  ;;  %v668_v30 = vadd.f32 %v667_v28, %v1378_v57 }
 0x1e2   :  { %v615_v43 = vpop.f32.mrf.mxu0 }
 0x1e3   :  { %v644_v29 = vpop.f32.mrf.mxu1  ;;  %v616_v23 = vadd.f32 %v615_v43, %v1386_v44 }
 0x1e4   :  { %v645_v20 = vadd.f32 %v644_v29, %v1386_v44 }
 0x1e6   :  { %v670_v47 = vpop.f32.mrf.mxu2 }
 0x1e7   :  { %v699_v48 = vpop.f32.mrf.mxu3  ;;  %v671_v16 = vadd.f32 %v670_v47, %v1393_v21 }
 0x1e8   :  { %v700_v18 = vadd.f32 %v699_v48, %v1393_v21 }
 0x1ea   :  { %v618_v37 = vpop.f32.mrf.mxu0 }
 0x1eb   :  { %v647_v22 = vpop.f32.mrf.mxu1  ;;  %v619_v38 = vadd.f32 %v618_v37, %v1374_v5 }
 0x1ec   :  { %v648_v34 = vadd.f32 %v647_v22, %v1374_v5 }
 0x1ed   :  { %976 = vtanh.f32 %v619_v38 }
 0x1ee   :  { %978 = vtanh.f32 %v648_v34  ;;  %v673_v41 = vpop.f32.mrf.mxu2 }
 0x1ef   :  { %v702_v42 = vpop.f32.mrf.mxu3  ;;  %980 = vtanh.f32 %v616_v23  ;;  %v674_v6 = vadd.f32 %v673_v41, %v1386_v44 }
 0x1f0   :  { %982 = vtanh.f32 %v645_v20  ;;  %v703_v52 = vadd.f32 %v702_v42, %v1386_v44 }
 0x1f1   :  { %984 = vtanh.f32 %v613_v39 }
 0x1f2   :  { %986 = vtanh.f32 %v642_v40 }
 0x1f3   :  { %v977_v13 = vpop.eup %976  ;;  %988 = vtanh.f32 %v610_v55 }
 0x1f4   :  { %v979_v31 = vpop.eup %978  ;;  %990 = vtanh.f32 %v639_v12  ;;  %736 = vmatpush.msrb.mxu0 %v977_v13 }
 0x1f5   :  { %v981_v11 = vpop.eup %980  ;;  %756 = vmatpush.msrb.mxu1 %v979_v31 }
 0x1f6   :  { %v983_v50 = vpop.eup %982  ;;  %v676_v15 = vpop.f32.mrf.mxu2  ;;  %737 = vmatpush.msrb.mxu0 %v981_v11 }
 0x1f7   :  { %v705_v63 = vpop.f32.mrf.mxu3  ;;  %v985_v4 = vpop.eup %984  ;;  %v677_v7 = vadd.f32 %v676_v15, %v1374_v5  ;;  %757 = vmatpush.msrb.mxu1 %v983_v50 }
 0x1f8   :  { %v706_v19 = vadd.f32 %v705_v63, %v1374_v5  ;;  %v987_v8 = vpop.eup %986  ;;  %738 = vmatpush.msrb.mxu0 %v985_v4  ;;  %v697_v5 = vadd.f32 %v696_v56, %v1378_v57 }
 0x1f9   :  { %v989_v61 = vpop.eup %988  ;;  %992 = vtanh.f32 %v677_v7  ;;  %758 = vmatpush.msrb.mxu1 %v987_v8 }
 0x1fa   :  { %v991_v17 = vpop.eup %990  ;;  %994 = vtanh.f32 %v706_v19  ;;  %739 = vmatpush.msrb.mxu0 %v989_v61 }
 0x1fb   :  { %996 = vtanh.f32 %v674_v6  ;;  %759 = vmatpush.msrb.mxu1 %v991_v17  ;;  %871 = vmatmul.msk.f32.vlgmr.msrb.gmra.mxu0 %vm243_vm0, %v1416_v0 }
 0x1fc   :  { %998 = vtanh.f32 %v703_v52  ;;  %872 = vmatmul.msk.f32.vlgmr.msrb.gmra.mxu1 %vm243_vm0, %v1416_v0 }
 0x1fd   :  { %1000 = vtanh.f32 %v671_v16 }
 0x1fe   :  { %1002 = vtanh.f32 %v700_v18 }
 0x1ff   :  { %v993_v44 = vpop.eup %992  ;;  %1004 = vtanh.f32 %v668_v30 }
 0x200   :  { %v995_v21 = vpop.eup %994  ;;  %1006 = vtanh.f32 %v697_v5  ;;  %776 = vmatpush.msrb.mxu2 %v993_v44 }
 0x201   :  { %v997_v24 = vpop.eup %996  ;;  %796 = vmatpush.msrb.mxu3 %v995_v21 }
 0x202   :  { %v999_v10 = vpop.eup %998  ;;  %777 = vmatpush.msrb.mxu2 %v997_v24 }
 0x203   :  { %v1001_v36 = vpop.eup %1000  ;;  %797 = vmatpush.msrb.mxu3 %v999_v10 }
 0x204   :  { %v1003_v54 = vpop.eup %1002  ;;  %778 = vmatpush.msrb.mxu2 %v1001_v36 }
 0x205   :  { %v1005_v57 = vpop.eup %1004  ;;  %798 = vmatpush.msrb.mxu3 %v1003_v54 }
 0x206   :  { %v1007_v51 = vpop.eup %1006  ;;  %779 = vmatpush.msrb.mxu2 %v1005_v57 }
 0x207   :  { %799 = vmatpush.msrb.mxu3 %v1007_v51  ;;  %873 = vmatmul.msk.f32.vlgmr.msrb.gmra.mxu2 %vm243_vm0, %v1416_v0 }
 0x208   :  { %874 = vmatmul.msk.f32.vlgmr.msrb.gmra.mxu3 %vm243_vm0, %v1416_v0 }
 0x278   :  { %v741_v2 = vpop.f32.mrf.mxu0 }
 0x279   :  { %v761_v58 = vpop.f32.mrf.mxu1  ;;  %v742_v0 = vadd.f32 %v741_v2, %v1470_v25 }
 0x27a   :  { %v762_v53 = vadd.f32 %v761_v58, %v1470_v25 }
 0x27c   :  { %v808_v32 = vrot.slane %v762_v53, 7 }
 0x27e   :  { %v811_v33 = vsel %vm478_vm1, %v742_v0, %v808_v32 }
 0x28a   :  { %v781_v1 = vpop.f32.mrf.mxu2 }
 0x28b   :  { %v782_v62 = vadd.f32 %v781_v1, %v1470_v25  ;;  %v801_v3 = vpop.f32.mrf.mxu3 }
 0x28c   :  { %v802_v45 = vadd.f32 %v801_v3, %v1470_v25 }
 0x28d   :  { %v809_v49 = vrot.slane %v782_v62, 6 }
 0x28e   :  { %v810_v14 = vrot.slane %v802_v45, 5 }
 0x290   :  { %v812_v9 = vsel %vm480_vm2, %v809_v49, %v810_v14 }
 0x291   :  { %v813_v26 = vsel %vm482_vm3, %v811_v33, %v812_v9 }
 0x292   :  { %816 = vst.msk [vmem:[#allocation3 + $0x4] sm:$0xf] %vm1476_vm4, %v813_v26 }
 0x293   :  { %827 = dma.vmem_to_hbm [thread:$0]  %s823_s10, 128, %s825_s12, [#allocation4]  }
 0x294   :  { %1032 = dma.done.wait [#allocation4], 128  }
 0x295   :  { %1033 = vsyncadd [#allocation4], 4294967168 }
 0x296   :  { %832 = vsyncpa [#allocation4], 1 }

</bundles_post_ra>
